<compile_context>
chip_gen: v7x
topology: tpu7x:2x2x1
jax: 0.10.0
libtpu: 0.0.40
codegen_flags: <defaults>
</compile_context>

<pallas_src>
import functools

import jax
import jax.numpy as jnp
from jax.experimental import pallas as pl
from jax.experimental.pallas import tpu as pltpu


def _round_up(x: int, m: int) -> int:
    return (x + m - 1) // m * m


# ---------------------------------------------------------------------------
# Kernels
# ---------------------------------------------------------------------------
def _linear_kernel(x_ref, w_ref, b_ref, o_ref):
    """Single-K-tile path: whole reduction inside one (tm, tn) output tile.

    x_ref: (tm, Cp) bf16, w_ref: (Cp, tn) bf16 (pre-transposed), b_ref: (1, tn) f32.
    """
    o_ref[...] = (
        jnp.dot(x_ref[...], w_ref[...], preferred_element_type=jnp.float32)
        + b_ref[...]
    ).astype(o_ref.dtype)


def _linear_kernel_ktiled(x_ref, w_ref, b_ref, o_ref, acc_ref):
    """K-tiled path (only for very large in_channels): f32 VMEM accumulator."""
    k = pl.program_id(2)

    @pl.when(k == 0)
    def _():
        acc_ref[...] = jnp.zeros_like(acc_ref)

    acc_ref[...] += jnp.dot(
        x_ref[...], w_ref[...], preferred_element_type=jnp.float32
    )

    @pl.when(k == pl.num_programs(2) - 1)
    def _():
        o_ref[...] = (acc_ref[...] + b_ref[...]).astype(o_ref.dtype)


# ---------------------------------------------------------------------------
# One-time parameter preparation (hoisted out of the per-call wrapper)
# ---------------------------------------------------------------------------
def prepare_classifier_params(weight, bias):
    """weight: (num_classes, in_channels) PyTorch layout; bias: (num_classes,).

    Returns:
      w_padded: (Cp, Np) bf16 -- transposed to (in, out) and padded to 128
                multiples so the kernel RHS is lane-dense.
      b_padded: (1, Np) f32.
    """
    N, C = weight.shape
    Cp, Np = _round_up(C, 128), _round_up(N, 128)
    w_t = jnp.transpose(weight.astype(jnp.bfloat16))            # (C, N)
    w_padded = jnp.pad(w_t, ((0, Cp - C), (0, Np - N)))
    b_padded = jnp.pad(bias.astype(jnp.float32), (0, Np - N)).reshape(1, Np)
    return w_padded, b_padded


# ---------------------------------------------------------------------------
# Forward
# ---------------------------------------------------------------------------
@functools.partial(jax.jit, static_argnames=("num_classes", "out_dtype"))
def classifier_head_forward(x, w_padded, b_padded, *, num_classes, out_dtype=None):
    """y = x @ weight.T + bias (PyTorch nn.Linear semantics).

    x:        (B, in_channels)
    w_padded: (Cp, Np) bf16 from prepare_classifier_params
    b_padded: (1, Np)  f32  from prepare_classifier_params
    returns   (B, num_classes) in x.dtype (or out_dtype if given).
    """
    B, C = x.shape
    Cp, Np = w_padded.shape
    N = num_classes
    assert C <= Cp and N <= Np, "prepared params do not match input shapes"
    out_dtype = x.dtype if out_dtype is None else out_dtype

    # ---- tile selection -----------------------------------------------------
    tm = min(_round_up(B, 16), 512)          # bf16 sublane multiple, capped
    Bp = _round_up(B, tm)

    if Cp <= 4096:                           # one K tile: no accumulator path
        tk = Cp
    else:
        tk = 2048
        while Cp % tk:
            tk -= 128
    single_k = (tk == Cp)

    tn = min(Np, 512)
    while Np % tn:
        tn -= 128
    # v7x megacore: if both parallel axes collapse to one block and N is
    # splittable, split N in two so both TensorCores stay busy.
    if Bp // tm == 1 and Np // tn == 1 and Np % 256 == 0:
        tn = Np // 2

    grid_i, grid_j = Bp // tm, Np // tn

    # ---- pad activations (small tensor; per-call cost is negligible) --------
    x_c = x.astype(jnp.bfloat16)
    if (Bp, Cp) != (B, C):
        x_c = jnp.pad(x_c, ((0, Bp - B), (0, Cp - C)))

    out_itemsize = jnp.dtype(out_dtype).itemsize
    cost = pl.CostEstimate(
        flops=2 * Bp * Np * Cp,
        transcendentals=0,
        bytes_accessed=(x_c.size * 2 * grid_j            # x re-read per N tile
                        + w_padded.size * 2 * grid_i     # w re-read per B tile
                        + b_padded.size * 4 * grid_i
                        + Bp * Np * out_itemsize),
    )
    compiler_params = pltpu.CompilerParams(
        dimension_semantics=(("parallel", "parallel") if single_k
                             else ("parallel", "parallel", "arbitrary")),
        vmem_limit_bytes=48 * 1024 * 1024,   # headroom on v7x's 64 MiB VMEM
    )

    if single_k:
        out = pl.pallas_call(
            _linear_kernel,
            out_shape=jax.ShapeDtypeStruct((Bp, Np), out_dtype),
            grid_spec=pltpu.PrefetchScalarGridSpec(
                num_scalar_prefetch=0,
                grid=(grid_i, grid_j),
                in_specs=[
                    pl.BlockSpec((tm, Cp), lambda i, j: (i, 0)),   # x tile
                    pl.BlockSpec((Cp, tn), lambda i, j: (0, j)),   # w (K, N)
                    pl.BlockSpec((1, tn), lambda i, j: (0, j)),    # bias
                ],
                out_specs=pl.BlockSpec((tm, tn), lambda i, j: (i, j)),
            ),
            compiler_params=compiler_params,
            cost_estimate=cost,
        )(x_c, w_padded, b_padded)
    else:
        out = pl.pallas_call(
            _linear_kernel_ktiled,
            out_shape=jax.ShapeDtypeStruct((Bp, Np), out_dtype),
            grid_spec=pltpu.PrefetchScalarGridSpec(
                num_scalar_prefetch=0,
                grid=(grid_i, grid_j, Cp // tk),
                in_specs=[
                    pl.BlockSpec((tm, tk), lambda i, j, k: (i, k)),
                    pl.BlockSpec((tk, tn), lambda i, j, k: (k, j)),
                    pl.BlockSpec((1, tn), lambda i, j, k: (0, j)),
                ],
                out_specs=pl.BlockSpec((tm, tn), lambda i, j, k: (i, j)),
                scratch_shapes=[pltpu.VMEM((tm, tn), jnp.float32)],
            ),
            compiler_params=compiler_params,
            cost_estimate=cost,
        )(x_c, w_padded, b_padded)

    if (Bp, Np) != (B, N):
        out = out[:B, :N]
    return out


# ---------------------------------------------------------------------------
# Demo / self-check
# ---------------------------------------------------------------------------
if __name__ == "__main__":
    batch, in_channels, num_classes = 2, 32, 8

    key = jax.random.PRNGKey(0)
    kx, kw, kb = jax.random.split(key, 3)

    x = jax.random.normal(kx, (batch, in_channels), dtype=jnp.float32)
    # PyTorch-style uniform(-1/sqrt(C), 1/sqrt(C)) init.
    bound = 1.0 / (in_channels ** 0.5)
    weight = jax.random.uniform(
        kw, (num_classes, in_channels), dtype=jnp.float32, minval=-bound, maxval=bound
    )
    bias = jax.random.uniform(
        kb, (num_classes,), dtype=jnp.float32, minval=-bound, maxval=bound
    )

    # One-time parameter prep (would be done at module init / weight load).
    w_padded, b_padded = prepare_classifier_params(weight, bias)

    y = classifier_head_forward(x, w_padded, b_padded, num_classes=num_classes)
    y = jax.block_until_ready(y)
    assert y.shape == (batch, num_classes)

    # Reference doing the same bf16-operand / f32-accumulate math as the kernel.
    xb = x.astype(jnp.bfloat16).astype(jnp.float32)
    wb = weight.astype(jnp.bfloat16).astype(jnp.float32)
    y_ref_bf16 = xb @ wb.T + bias
    assert jnp.allclose(y, y_ref_bf16, atol=1e-4, rtol=1e-4), "mismatch vs bf16 reference"

    # Semantic check against the full-f32 nn.Linear reference (bf16 tolerance).
    y_ref_f32 = x @ weight.T + bias
    assert jnp.allclose(y, y_ref_f32, atol=3e-2, rtol=3e-2), "mismatch vs f32 reference"

    print("KERNEL_OK")
</pallas_src>

<mosaic_0001>
module attributes {stable_mosaic.version = 11 : i64} {
  func.func @_linear_kernel(%arg0: i32, %arg1: i32, %arg2: memref<16x128xbf16, #tpu.memory_space<vmem>>, %arg3: memref<128x128xbf16, #tpu.memory_space<vmem>>, %arg4: memref<1x128xf32, #tpu.memory_space<vmem>>, %arg5: memref<16x128xf32, #tpu.memory_space<vmem>>) attributes {dimension_semantics = [#tpu.dimension_semantics<parallel>, #tpu.dimension_semantics<parallel>], iteration_bounds = array<i64: 1, 1>, scalar_prefetch = 0 : i64, scratch_operands = 0 : i64, tpu.core_type = #tpu.core_type<tc>, window_params = [{transform_indices = @transform_0, window_bounds = array<i64: 16, 128>}, {transform_indices = @transform_1, window_bounds = array<i64: 128, 128>}, {transform_indices = @transform_2, window_bounds = array<i64: 1, 128>}, {transform_indices = @transform_3, window_bounds = array<i64: 16, 128>}]} {
    %c0 = arith.constant 0 : index
    %c0_0 = arith.constant 0 : index
    %0 = vector.load %arg2[%c0, %c0_0] : memref<16x128xbf16, #tpu.memory_space<vmem>>, vector<16x128xbf16>
    %c0_1 = arith.constant 0 : index
    %c0_2 = arith.constant 0 : index
    %1 = vector.load %arg3[%c0_1, %c0_2] : memref<128x128xbf16, #tpu.memory_space<vmem>>, vector<128x128xbf16>
    %cst = arith.constant dense<0.000000e+00> : vector<16x128xf32>
    %2 = tpu.matmul %0, %1, %cst {dimension_numbers = #tpu.dot_dimension_numbers<[1], [0], [0], [1], [0, 0, 1, 1], [], []>} : vector<16x128xbf16>, vector<128x128xbf16>, vector<16x128xf32> -> vector<16x128xf32>
    %c0_3 = arith.constant 0 : index
    %c0_4 = arith.constant 0 : index
    %3 = vector.load %arg4[%c0_3, %c0_4] : memref<1x128xf32, #tpu.memory_space<vmem>>, vector<1x128xf32>
    %4 = vector.broadcast %3 : vector<1x128xf32> to vector<16x128xf32>
    %5 = arith.addf %2, %4 : vector<16x128xf32>
    %c0_5 = arith.constant 0 : index
    %c0_6 = arith.constant 0 : index
    %6 = vector.load %arg5[%c0_5, %c0_6] : memref<16x128xf32, #tpu.memory_space<vmem>>, vector<16x128xf32>
    tpu.vector_store %arg5[%c0_5, %c0_6], %5 {strides = array<i32>} : memref<16x128xf32, #tpu.memory_space<vmem>>, vector<16x128xf32>,
    return
  }
  func.func @transform_0(%arg0: i32, %arg1: i32) -> (i32, i32) {
    %c0_i32 = arith.constant 0 : i32
    %c0_i32_0 = arith.constant 0 : i32
    return %arg0, %c0_i32 : i32, i32
  }
  func.func @transform_1(%arg0: i32, %arg1: i32) -> (i32, i32) {
    %c0_i32 = arith.constant 0 : i32
    %c0_i32_0 = arith.constant 0 : i32
    return %c0_i32, %arg1 : i32, i32
  }
  func.func @transform_2(%arg0: i32, %arg1: i32) -> (i32, i32) {
    %c0_i32 = arith.constant 0 : i32
    %c0_i32_0 = arith.constant 0 : i32
    return %c0_i32, %arg1 : i32, i32
  }
  func.func @transform_3(%arg0: i32, %arg1: i32) -> (i32, i32) {
    %c0_i32 = arith.constant 0 : i32
    return %arg0, %arg1 : i32, i32
  }
}

</mosaic_0001>

<bundles_post_ra>
// kernel: classifier_head_forward.1
= control target key start
LH: loop header
LB: loop body
LE: loop exit
PB: predicated region body
PF: predicated region fallthrough
CT: control target
= control target key end

     0   :  { %8 = vsyncpa [#allocation3], 0  ;;  %s233_s12 = smov [#allocation2]   ;;  %s282_s0 = inlined_call_operand.vmem [shape: bf16[16,128], index: 0, kind: input, shape index: {}]   ;;  %s283_s1 = inlined_call_operand.hbm [shape: bf16[128,128], index: 1, kind: input, shape index: {}]   ;;  %s284_s2 = inlined_call_operand.vmem [shape: f32[1,128], index: 2, kind: input, shape index: {}]   ;;  %s285_s3 = inlined_call_operand.vmem [shape: f32[16,128], index: 3, kind: output, shape index: {}]  }
   0x1   :  { %s16_s13 = sshll.u32 %s233_s12, 4  ;;  %s209_s16 = scalar_lea.hbm %s283_s1, 1024  ;;  %s17_s13 = int_to_ptr.vmem [resolvable:$true] %s16_s13 }
   0x2   :  { %p210_p0 = scmp.ne.s32.totalorder %s283_s1, %s209_s16  ;;  %p213_p1 = scmp.lt.u32.totalorder %s209_s16, %s283_s1 }
   0x4   :  { %p215_p2 = pnand %p213_p1, %p210_p0 }
   0x6   :  { %218 = shalt.err (!%p215_p2)
}
   0x7   :  { %s219_s21 = scalar_lea.vmem %s17_s13, 1024  ;;  %p224_p4 = scmp.lt.s32.totalorder %s17_s13, %s17_s13 }
   0x8   :  { %p220_p3 = scmp.ne.s32.totalorder %s17_s13, %s219_s21  ;;  %p225_p5 = scmp.lt.s32.totalorder %s219_s21, %s219_s21 }
   0xa   :  { %p226_p6 = por %p225_p5, %p224_p4 }
   0xc   :  { %p227_p7 = pnand %p226_p6, %p220_p3 }
   0xe   :  { %230 = shalt.err (!%p227_p7)
}
   0xf   :  { %s234_s22 = smov 64   ;;  %s235_s23 = smov 4  }
  0x10   :  { %22 = dma.hbm_to_vmem [thread:$0]  %s283_s1, 1024, %s17_s13, [#allocation3], %s234_s22, %s234_s22, %s235_s23  }
  0x11   :  { %231 = dma.done.wait [#allocation3], 1024  }
  0x12   :  { %232 = vsyncadd [#allocation3], 4294966272  ;;  %v236_v0 = vmov 0.0   ;;  %vm237_vm0 = vmmov 0   ;;  %v200_v1 = vld [vmem:[#allocation2] sm:$0xff]   ;;  %v201_v2 = vld [vmem:[#allocation2 + $0x8] sm:$0xff]  }
  0x13   :  { %175 = vmatprep.subr.bf16.mxu0 %v236_v0  ;;  %191 = vmatprep.mubr.msk.bf16.mxu0 %vm237_vm0, %v236_v0  ;;  %v202_v3 = vld [vmem:[#allocation2 + $0x10] sm:$0xff]   ;;  %v203_v4 = vld [vmem:[#allocation2 + $0x18] sm:$0xff]   ;;  %v204_v5 = vld [vmem:[#allocation2 + $0x20] sm:$0xff]  }
  0x14   :  { %176 = vmatpush3.bf16.msra.mxu0 %v200_v1  ;;  %v205_v6 = vld [vmem:[#allocation2 + $0x28] sm:$0xff]   ;;  %v206_v7 = vld [vmem:[#allocation2 + $0x30] sm:$0xff]   ;;  %v207_v8 = vld [vmem:[#allocation2 + $0x38] sm:$0xff]  }
  0x15   :  { %177 = vmatprep.subr.bf16.mxu0 %v236_v0  ;;  %v208_v9 = vld [vmem:[%s282_s0] sm:$0xff]  }
  0x16   :  { %v156_v10 = vld [vmem:[%s284_s2] ss:$0 sm:$0xff] }
  0x18   :  { %178 = vmatpush3.bf16.msra.mxu0 %v201_v2 }
  0x19   :  { %179 = vmatprep.subr.bf16.mxu0 %v236_v0 }
  0x1c   :  { %180 = vmatpush3.bf16.msra.mxu0 %v202_v3 }
  0x1d   :  { %181 = vmatprep.subr.bf16.mxu0 %v236_v0 }
  0x20   :  { %182 = vmatpush3.bf16.msra.mxu0 %v203_v4 }
  0x21   :  { %183 = vmatprep.subr.bf16.mxu0 %v236_v0 }
  0x24   :  { %184 = vmatpush3.bf16.msra.mxu0 %v204_v5 }
  0x25   :  { %185 = vmatprep.subr.bf16.mxu0 %v236_v0 }
  0x28   :  { %186 = vmatpush3.bf16.msra.mxu0 %v205_v6 }
  0x29   :  { %187 = vmatprep.subr.bf16.mxu0 %v236_v0 }
  0x2c   :  { %188 = vmatpush3.bf16.msra.mxu0 %v206_v7 }
  0x2d   :  { %189 = vmatprep.subr.bf16.mxu0 %v236_v0 }
  0x30   :  { %190 = vmatpush3.bf16.msra.mxu0 %v207_v8 }
  0x33   :  { %192 = vmatmul.mubr.bf16.vlgmr.msra.gmra.mrb[0].mxu0 %v208_v9 }
 0x106   :  { %v142_v11 = vpop.f32.mrb[0].mxu0 }
 0x107   :  { %v143_v12 = vadd.f32 %v156_v10, %v142_v11  ;;  %v193_v13 = vpop.f32.mrb[1].mxu0 }
 0x108   :  { %v145_v14 = vpop.f32.mrb[2].mxu0 }
 0x109   :  { %149 = vst [vmem:[%s285_s3] sm:$0xff] %v143_v12  ;;  %v146_v15 = vadd.f32 %v156_v10, %v145_v14  ;;  %v194_v16 = vpop.f32.mrb[3].mxu0 }
 0x10b   :  { %150 = vst [vmem:[%s285_s3 + $0x8] sm:$0xff] %v146_v15 }
 0x10c   :  { %155 = vsyncpa [#allocation3], 1 }

</bundles_post_ra>
